<compile_context>
chip_gen: v6e
topology: v6e:2x2x1
jax: 0.10.0
libtpu: 0.0.40
codegen_flags: <defaults>
</compile_context>

<pallas_src>
from functools import partial

import jax
import jax.numpy as jnp
from jax import lax
from jax.experimental import pallas as pl
from jax.experimental.pallas import tpu as pltpu


_NEG_MAX_F32 = float(-jnp.finfo(jnp.float32).max)


def _pick_tile(n, preferred=(256, 128)):
    """Largest preferred tile that divides n, else the whole axis."""
    for t in preferred:
        if n % t == 0:
            return t
    return n


def _flash_attend_kernel(q_ref, k_ref, v_ref, *refs,
                         scale, causal, has_sim, nq, nk, tq, tk):
    if has_sim:
        o_ref, sim_ref, m_sc, l_sc, acc_sc = refs
    else:
        o_ref, m_sc, l_sc, acc_sc = refs
        sim_ref = None

    qi = pl.program_id(1)
    ki = pl.program_id(2)

    @pl.when(ki == 0)
    def _init():
        m_sc[...] = jnp.full_like(m_sc, -jnp.inf)
        l_sc[...] = jnp.zeros_like(l_sc)
        acc_sc[...] = jnp.zeros_like(acc_sc)

    def compute_dots():
        # q @ k^T without materializing a transpose: contract dim 1 on both sides.
        # Operands stay in their native dtype (bf16 -> bf16 MXU pass), f32 accumulate.
        dots = lax.dot_general(
            q_ref[...], k_ref[...],
            dimension_numbers=(((1,), (1,)), ((), ())),
            preferred_element_type=jnp.float32,
        )
        return dots * scale

    def accumulate(dots):
        if causal:
            row = lax.broadcasted_iota(jnp.int32, (tq, tk), 0) + qi * tq
            col = lax.broadcasted_iota(jnp.int32, (tq, tk), 1) + ki * tk
            dots = jnp.where(col > row + (nk - nq), _NEG_MAX_F32, dots)
        m_prev = m_sc[...]
        m_new = jnp.maximum(m_prev, dots.max(axis=-1, keepdims=True))
        alpha = jnp.exp(m_prev - m_new)
        p = jnp.exp(dots - m_new)
        l_sc[...] = alpha * l_sc[...] + p.sum(axis=-1, keepdims=True)
        acc_sc[...] = alpha * acc_sc[...] + jnp.dot(
            p.astype(v_ref.dtype), v_ref[...], preferred_element_type=jnp.float32)
        m_sc[...] = m_new

    # A key block is fully causally masked iff its first column is beyond the last
    # allowed column of the last row of this query block.
    if causal:
        block_live = ki * tk <= qi * tq + (tq - 1) + (nk - nq)

    if has_sim:
        # qk_similarities are pre-mask, so dots must be computed for every block.
        dots = compute_dots()
        sim_ref[...] = dots.astype(sim_ref.dtype)
        if causal:
            @pl.when(block_live)
            def _update():
                accumulate(dots)
        else:
            accumulate(dots)
    else:
        if causal:
            @pl.when(block_live)
            def _update():
                accumulate(compute_dots())
        else:
            accumulate(compute_dots())

    @pl.when(ki == pl.num_programs(2) - 1)
    def _finalize():
        inv_l = pl.reciprocal(l_sc[...], approx=True)
        o_ref[...] = (acc_sc[...] * inv_l).astype(o_ref.dtype)


def attend(q, k, v, *, causal=False, scale=None, return_qk_similarities=False,
           block_q=None, block_k=None):
    """Pallas equivalent of Attend.forward(q, k, v) with mask/attn_bias/prev_attn = None.

    Returns (out, (keys, values, qk_similarities)) mirroring AttentionIntermediates.
    qk_similarities is None unless `return_qk_similarities=True` (matches the efficient
    path of the PyTorch module, which never materializes them).
    """
    # TODO(synk): mask / attn_bias / prev_attn and training-mode attention dropout are
    # not implemented (the reference forward is exercised with them = None, dropout=0).
    assert q.ndim == 4, "expect q as [B, H, N, D]"
    B, H, Nq, D = q.shape
    keys_out, values_out = k, v
    if k.ndim == 3:  # 'b j d' shared across heads
        k = jnp.broadcast_to(k[:, None], (B, H, k.shape[1], k.shape[2]))
    if v.ndim == 3:
        v = jnp.broadcast_to(v[:, None], (B, H, v.shape[1], v.shape[2]))
    Nk = k.shape[2]
    if scale is None:
        scale = D ** (-0.5)

    tq = block_q if block_q is not None else _pick_tile(Nq)
    tk = block_k if block_k is not None else _pick_tile(Nk)
    assert Nq % tq == 0 and Nk % tk == 0

    causal = bool(causal)
    has_sim = bool(return_qk_similarities)

    # Flatten (B, H) into a single grid axis.
    qf = q.reshape(B * H, Nq, D)
    kf = k.reshape(B * H, Nk, D)
    vf = v.reshape(B * H, Nk, D)

    grid = (B * H, Nq // tq, Nk // tk)

    def _clamp_live_ki(qi, ki):
        # Last key block index that contains at least one causally-visible column
        # for this query block. Clamping the index_map means fully-masked blocks
        # re-request the previous (already resident) block -> no DMA is issued.
        last_live = (qi * tq + (tq - 1) + (Nk - Nq)) // tk
        last_live = jnp.maximum(last_live, 0)
        return jnp.minimum(ki, last_live)

    def q_index_map(bh, qi, ki):
        return (bh, qi, 0)

    def k_index_map(bh, qi, ki):
        if causal and not has_sim:       # with sims, dots are needed for every block
            ki = _clamp_live_ki(qi, ki)
        return (bh, ki, 0)

    def v_index_map(bh, qi, ki):
        if causal:                        # v only read inside the live-block branch
            ki = _clamp_live_ki(qi, ki)
        return (bh, ki, 0)

    in_specs = [
        pl.BlockSpec((None, tq, D), q_index_map),   # q (resident across ki)
        pl.BlockSpec((None, tk, D), k_index_map),   # k
        pl.BlockSpec((None, tk, D), v_index_map),   # v
    ]

    out_shape = [jax.ShapeDtypeStruct((B * H, Nq, D), q.dtype)]
    out_specs = [pl.BlockSpec((None, tq, D), lambda bh, qi, ki: (bh, qi, 0))]
    if has_sim:
        # Emitted in the input dtype (matches the PyTorch dots dtype) per (qi, ki) tile.
        out_shape.append(jax.ShapeDtypeStruct((B * H, Nq, Nk), q.dtype))
        out_specs.append(pl.BlockSpec((None, tq, tk), lambda bh, qi, ki: (bh, qi, ki)))

    kernel = partial(
        _flash_attend_kernel,
        scale=float(scale),
        causal=causal,
        has_sim=has_sim,
        nq=Nq, nk=Nk, tq=tq, tk=tk,
    )

    results = pl.pallas_call(
        kernel,
        out_shape=tuple(out_shape),
        grid_spec=pltpu.PrefetchScalarGridSpec(
            num_scalar_prefetch=0,
            grid=grid,
            in_specs=in_specs,
            out_specs=out_specs,
            scratch_shapes=[
                pltpu.VMEM((tq, 1), jnp.float32),   # running max m
                pltpu.VMEM((tq, 1), jnp.float32),   # running denom l
                pltpu.VMEM((tq, D), jnp.float32),   # output accumulator
            ],
        ),
        compiler_params=pltpu.CompilerParams(
            dimension_semantics=("parallel", "parallel", "arbitrary"),
        ),
    )(qf, kf, vf)

    out = results[0].reshape(B, H, Nq, D)
    qk_sims = results[1].reshape(B, H, Nq, Nk) if has_sim else None
    intermediates = (keys_out, values_out, qk_sims)
    return out, intermediates


def _reference_attend(q, k, v, *, causal=False, scale=None):
    """Pure-JAX reference (f32 math, highest matmul precision)."""
    D = q.shape[-1]
    if scale is None:
        scale = D ** (-0.5)
    if k.ndim == 3:
        k = jnp.broadcast_to(k[:, None], (q.shape[0], q.shape[1], k.shape[1], k.shape[2]))
    if v.ndim == 3:
        v = jnp.broadcast_to(v[:, None], (q.shape[0], q.shape[1], v.shape[1], v.shape[2]))
    qf, kf, vf = (x.astype(jnp.float32) for x in (q, k, v))
    dots = jnp.einsum("bhid,bhjd->bhij", qf, kf,
                      precision=lax.Precision.HIGHEST) * scale
    sims = dots
    if causal:
        i, j = dots.shape[-2:]
        row = jnp.arange(i)[:, None]
        col = jnp.arange(j)[None, :]
        dots = jnp.where(col > row + (j - i), _NEG_MAX_F32, dots)
    attn = jax.nn.softmax(dots, axis=-1)
    out = jnp.einsum("bhij,bhjd->bhid", attn, vf,
                     precision=lax.Precision.HIGHEST)
    return out, sims


if __name__ == "__main__":
    key = jax.random.PRNGKey(0)
    kq, kk, kv = jax.random.split(key, 3)

    # ---- Test 1: small f32, single block, non-causal, with qk_similarities ----
    B, H, N, D = 2, 4, 8, 32
    q = jax.random.normal(kq, (B, H, N, D), dtype=jnp.float32)
    k = jax.random.normal(kk, (B, H, N, D), dtype=jnp.float32)
    v = jax.random.normal(kv, (B, H, N, D), dtype=jnp.float32)

    out, (_, _, sims) = attend(q, k, v, causal=False, return_qk_similarities=True)
    jax.block_until_ready(out)
    ref_out, ref_sims = _reference_attend(q, k, v, causal=False)
    assert jnp.allclose(out, ref_out, atol=3e-2, rtol=3e-2), "non-causal out mismatch"
    assert jnp.allclose(sims, ref_sims, atol=3e-2, rtol=3e-2), "non-causal sims mismatch"

    # ---- Test 2: f32 causal, multi-block tiling (online softmax + block skipping) ----
    N2 = 256
    q2 = jax.random.normal(kq, (B, H, N2, D), dtype=jnp.float32)
    k2 = jax.random.normal(kk, (B, H, N2, D), dtype=jnp.float32)
    v2 = jax.random.normal(kv, (B, H, N2, D), dtype=jnp.float32)
    out2, (_, _, sims2) = attend(q2, k2, v2, causal=True, return_qk_similarities=True,
                                 block_q=128, block_k=128)
    jax.block_until_ready(out2)
    ref_out2, ref_sims2 = _reference_attend(q2, k2, v2, causal=True)
    assert jnp.allclose(out2, ref_out2, atol=3e-2, rtol=3e-2), "causal out mismatch"
    assert jnp.allclose(sims2, ref_sims2, atol=3e-2, rtol=3e-2), "causal sims mismatch"

    # ---- Test 3: bf16 causal, no sims (fast path: bf16 MXU, clamped k/v DMA) ----
    q3, k3, v3 = (x.astype(jnp.bfloat16) for x in (q2, k2, v2))
    out3, (_, _, sims3) = attend(q3, k3, v3, causal=True, block_q=128, block_k=128)
    jax.block_until_ready(out3)
    assert sims3 is None
    ref_out3, _ = _reference_attend(q3, k3, v3, causal=True)
    assert jnp.allclose(out3.astype(jnp.float32), ref_out3, atol=5e-2, rtol=6e-2), \
        "bf16 causal out mismatch"

    # ---- Test 4: cross-attention style, k/v shared across heads ('b j d') ----
    k4 = jax.random.normal(kk, (B, N2, D), dtype=jnp.float32)
    v4 = jax.random.normal(kv, (B, N2, D), dtype=jnp.float32)
    out4, _ = attend(q2, k4, v4, causal=False)
    jax.block_until_ready(out4)
    ref_out4, _ = _reference_attend(q2, k4, v4, causal=False)
    assert jnp.allclose(out4, ref_out4, atol=3e-2, rtol=3e-2), "shared-kv out mismatch"

    print("KERNEL_OK")
</pallas_src>

<mosaic_0001>
module attributes {stable_mosaic.version = 11 : i64} {
  func.func @_flash_attend_kernel(%arg0: i32, %arg1: i32, %arg2: i32, %arg3: memref<1x8x32xf32, #tpu.memory_space<vmem>>, %arg4: memref<1x8x32xf32, #tpu.memory_space<vmem>>, %arg5: memref<1x8x32xf32, #tpu.memory_space<vmem>>, %arg6: memref<1x8x32xf32, #tpu.memory_space<vmem>>, %arg7: memref<1x8x8xf32, #tpu.memory_space<vmem>>, %arg8: memref<8x1xf32, #tpu.memory_space<vmem>>, %arg9: memref<8x1xf32, #tpu.memory_space<vmem>>, %arg10: memref<8x32xf32, #tpu.memory_space<vmem>>) attributes {dimension_semantics = [#tpu.dimension_semantics<parallel>, #tpu.dimension_semantics<parallel>, #tpu.dimension_semantics<arbitrary>], iteration_bounds = array<i64: 8, 1, 1>, scalar_prefetch = 0 : i64, scratch_operands = 3 : i64, tpu.core_type = #tpu.core_type<tc>, window_params = [{transform_indices = @transform_0, window_bounds = array<i64: 1, 8, 32>}, {transform_indices = @transform_1, window_bounds = array<i64: 1, 8, 32>}, {transform_indices = @transform_2, window_bounds = array<i64: 1, 8, 32>}, {transform_indices = @transform_3, window_bounds = array<i64: 1, 8, 32>}, {transform_indices = @transform_4, window_bounds = array<i64: 1, 8, 8>}]} {
    %c0_i32 = arith.constant 0 : i32
    %0 = arith.cmpi eq, %arg2, %c0_i32 : i32
    %1 = arith.extui %0 : i1 to i32
    %c0_i32_0 = arith.constant 0 : i32
    %2 = arith.cmpi ne, %1, %c0_i32_0 : i32
    scf.if %2 {
      %cst_30 = arith.constant 0xFF800000 : f32
      %40 = vector.broadcast %cst_30 : f32 to vector<8x1xf32>
      %c0_31 = arith.constant 0 : index
      %c0_32 = arith.constant 0 : index
      %41 = vector.load %arg8[%c0_31, %c0_32] : memref<8x1xf32, #tpu.memory_space<vmem>>, vector<8x1xf32>
      tpu.vector_store %arg8[%c0_31, %c0_32], %40 {strides = array<i32>} : memref<8x1xf32, #tpu.memory_space<vmem>>, vector<8x1xf32>,
      %cst_33 = arith.constant 0.000000e+00 : f32
      %42 = vector.broadcast %cst_33 : f32 to vector<8x1xf32>
      %c0_34 = arith.constant 0 : index
      %c0_35 = arith.constant 0 : index
      %43 = vector.load %arg9[%c0_34, %c0_35] : memref<8x1xf32, #tpu.memory_space<vmem>>, vector<8x1xf32>
      tpu.vector_store %arg9[%c0_34, %c0_35], %42 {strides = array<i32>} : memref<8x1xf32, #tpu.memory_space<vmem>>, vector<8x1xf32>,
      %cst_36 = arith.constant 0.000000e+00 : f32
      %44 = vector.broadcast %cst_36 : f32 to vector<8x32xf32>
      %c0_37 = arith.constant 0 : index
      %c0_38 = arith.constant 0 : index
      %45 = vector.load %arg10[%c0_37, %c0_38] : memref<8x32xf32, #tpu.memory_space<vmem>>, vector<8x32xf32>
      tpu.vector_store %arg10[%c0_37, %c0_38], %44 {strides = array<i32>} : memref<8x32xf32, #tpu.memory_space<vmem>>, vector<8x32xf32>,
    } else {
    }
    %c0 = arith.constant 0 : index
    %c0_1 = arith.constant 0 : index
    %c0_2 = arith.constant 0 : index
    %3 = vector.load %arg3[%c0, %c0_1, %c0_2] : memref<1x8x32xf32, #tpu.memory_space<vmem>>, vector<1x8x32xf32>
    %4 = vector.shape_cast %3 : vector<1x8x32xf32> to vector<8x32xf32>
    %c0_3 = arith.constant 0 : index
    %c0_4 = arith.constant 0 : index
    %c0_5 = arith.constant 0 : index
    %5 = vector.load %arg4[%c0_3, %c0_4, %c0_5] : memref<1x8x32xf32, #tpu.memory_space<vmem>>, vector<1x8x32xf32>
    %6 = vector.shape_cast %5 : vector<1x8x32xf32> to vector<8x32xf32>
    %cst = arith.constant dense<0.000000e+00> : vector<8x8xf32>
    %7 = tpu.matmul %4, %6, %cst {dimension_numbers = #tpu.dot_dimension_numbers<[1], [1], [0], [0], [0, 0, 1, 0], [], []>} : vector<8x32xf32>, vector<8x32xf32>, vector<8x8xf32> -> vector<8x8xf32>
    %cst_6 = arith.constant 0.176776692 : f32
    %8 = vector.broadcast %cst_6 : f32 to vector<8x8xf32>
    %9 = arith.mulf %7, %8 : vector<8x8xf32>
    %c0_7 = arith.constant 0 : index
    %c0_8 = arith.constant 0 : index
    %c0_9 = arith.constant 0 : index
    %10 = vector.load %arg7[%c0_7, %c0_8, %c0_9] : memref<1x8x8xf32, #tpu.memory_space<vmem>>, vector<1x8x8xf32>
    %11 = vector.shape_cast %10 : vector<1x8x8xf32> to vector<8x8xf32>
    %12 = vector.shape_cast %9 : vector<8x8xf32> to vector<1x8x8xf32>
    tpu.vector_store %arg7[%c0_7, %c0_8, %c0_9], %12 {strides = array<i32>} : memref<1x8x8xf32, #tpu.memory_space<vmem>>, vector<1x8x8xf32>,
    %c0_10 = arith.constant 0 : index
    %c0_11 = arith.constant 0 : index
    %13 = vector.load %arg8[%c0_10, %c0_11] : memref<8x1xf32, #tpu.memory_space<vmem>>, vector<8x1xf32>
    %cst_12 = arith.constant dense<0xFF800000> : vector<8xf32>
    %14 = vector.multi_reduction <maximumf>, %9, %cst_12 [1] : vector<8x8xf32> to vector<8xf32>
    %15 = vector.shape_cast %14 : vector<8xf32> to vector<8x1xf32>
    %16 = arith.maximumf %13, %15 : vector<8x1xf32>
    %17 = arith.subf %13, %16 : vector<8x1xf32>
    %18 = math.exp %17 : vector<8x1xf32>
    %19 = vector.broadcast %16 : vector<8x1xf32> to vector<8x8xf32>
    %20 = arith.subf %9, %19 : vector<8x8xf32>
    %21 = math.exp %20 : vector<8x8xf32>
    %c0_13 = arith.constant 0 : index
    %c0_14 = arith.constant 0 : index
    %22 = vector.load %arg9[%c0_13, %c0_14] : memref<8x1xf32, #tpu.memory_space<vmem>>, vector<8x1xf32>
    %23 = arith.mulf %18, %22 : vector<8x1xf32>
    %cst_15 = arith.constant dense<0.000000e+00> : vector<8xf32>
    %24 = vector.multi_reduction <add>, %21, %cst_15 [1] : vector<8x8xf32> to vector<8xf32>
    %25 = vector.shape_cast %24 : vector<8xf32> to vector<8x1xf32>
    %26 = arith.addf %23, %25 : vector<8x1xf32>
    %c0_16 = arith.constant 0 : index
    %c0_17 = arith.constant 0 : index
    %27 = vector.load %arg9[%c0_16, %c0_17] : memref<8x1xf32, #tpu.memory_space<vmem>>, vector<8x1xf32>
    tpu.vector_store %arg9[%c0_16, %c0_17], %26 {strides = array<i32>} : memref<8x1xf32, #tpu.memory_space<vmem>>, vector<8x1xf32>,
    %c0_18 = arith.constant 0 : index
    %c0_19 = arith.constant 0 : index
    %28 = vector.load %arg10[%c0_18, %c0_19] : memref<8x32xf32, #tpu.memory_space<vmem>>, vector<8x32xf32>
    %29 = vector.broadcast %18 : vector<8x1xf32> to vector<8x32xf32>
    %30 = arith.mulf %29, %28 : vector<8x32xf32>
    %c0_20 = arith.constant 0 : index
    %c0_21 = arith.constant 0 : index
    %c0_22 = arith.constant 0 : index
    %31 = vector.load %arg5[%c0_20, %c0_21, %c0_22] : memref<1x8x32xf32, #tpu.memory_space<vmem>>, vector<1x8x32xf32>
    %32 = vector.shape_cast %31 : vector<1x8x32xf32> to vector<8x32xf32>
    %cst_23 = arith.constant dense<0.000000e+00> : vector<8x32xf32>
    %33 = tpu.matmul %21, %32, %cst_23 {dimension_numbers = #tpu.dot_dimension_numbers<[1], [0], [0], [1], [0, 0, 1, 1], [], []>} : vector<8x8xf32>, vector<8x32xf32>, vector<8x32xf32> -> vector<8x32xf32>
    %34 = arith.addf %30, %33 : vector<8x32xf32>
    %c0_24 = arith.constant 0 : index
    %c0_25 = arith.constant 0 : index
    %35 = vector.load %arg10[%c0_24, %c0_25] : memref<8x32xf32, #tpu.memory_space<vmem>>, vector<8x32xf32>
    tpu.vector_store %arg10[%c0_24, %c0_25], %34 {strides = array<i32>} : memref<8x32xf32, #tpu.memory_space<vmem>>, vector<8x32xf32>,
    %c0_26 = arith.constant 0 : index
    %c0_27 = arith.constant 0 : index
    %36 = vector.load %arg8[%c0_26, %c0_27] : memref<8x1xf32, #tpu.memory_space<vmem>>, vector<8x1xf32>
    tpu.vector_store %arg8[%c0_26, %c0_27], %16 {strides = array<i32>} : memref<8x1xf32, #tpu.memory_space<vmem>>, vector<8x1xf32>,
    %c0_i32_28 = arith.constant 0 : i32
    %37 = arith.cmpi eq, %arg2, %c0_i32_28 : i32
    %38 = arith.extui %37 : i1 to i32
    %c0_i32_29 = arith.constant 0 : i32
    %39 = arith.cmpi ne, %38, %c0_i32_29 : i32
    scf.if %39 {
      %c0_30 = arith.constant 0 : index
      %c0_31 = arith.constant 0 : index
      %40 = vector.load %arg9[%c0_30, %c0_31] : memref<8x1xf32, #tpu.memory_space<vmem>>, vector<8x1xf32>
      %41 = tpu.reciprocal %40 {approx = true} : vector<8x1xf32> -> vector<8x1xf32>
      %c0_32 = arith.constant 0 : index
      %c0_33 = arith.constant 0 : index
      %42 = vector.load %arg10[%c0_32, %c0_33] : memref<8x32xf32, #tpu.memory_space<vmem>>, vector<8x32xf32>
      %43 = vector.broadcast %41 : vector<8x1xf32> to vector<8x32xf32>
      %44 = arith.mulf %42, %43 : vector<8x32xf32>
      %c0_34 = arith.constant 0 : index
      %c0_35 = arith.constant 0 : index
      %c0_36 = arith.constant 0 : index
      %45 = vector.load %arg6[%c0_34, %c0_35, %c0_36] : memref<1x8x32xf32, #tpu.memory_space<vmem>>, vector<1x8x32xf32>
      %46 = vector.shape_cast %45 : vector<1x8x32xf32> to vector<8x32xf32>
      %47 = vector.shape_cast %44 : vector<8x32xf32> to vector<1x8x32xf32>
      tpu.vector_store %arg6[%c0_34, %c0_35, %c0_36], %47 {strides = array<i32>} : memref<1x8x32xf32, #tpu.memory_space<vmem>>, vector<1x8x32xf32>,
    } else {
    }
    return
  }
  func.func @transform_0(%arg0: i32, %arg1: i32, %arg2: i32) -> (i32, i32, i32) {
    %c0_i32 = arith.constant 0 : i32
    %c0_i32_0 = arith.constant 0 : i32
    return %arg0, %arg1, %c0_i32 : i32, i32, i32
  }
  func.func @transform_1(%arg0: i32, %arg1: i32, %arg2: i32) -> (i32, i32, i32) {
    %c0_i32 = arith.constant 0 : i32
    %c0_i32_0 = arith.constant 0 : i32
    return %arg0, %arg2, %c0_i32 : i32, i32, i32
  }
  func.func @transform_2(%arg0: i32, %arg1: i32, %arg2: i32) -> (i32, i32, i32) {
    %c0_i32 = arith.constant 0 : i32
    %c0_i32_0 = arith.constant 0 : i32
    return %arg0, %arg2, %c0_i32 : i32, i32, i32
  }
  func.func @transform_3(%arg0: i32, %arg1: i32, %arg2: i32) -> (i32, i32, i32) {
    %c0_i32 = arith.constant 0 : i32
    %c0_i32_0 = arith.constant 0 : i32
    return %arg0, %arg1, %c0_i32 : i32, i32, i32
  }
  func.func @transform_4(%arg0: i32, %arg1: i32, %arg2: i32) -> (i32, i32, i32) {
    %c0_i32 = arith.constant 0 : i32
    return %arg0, %arg1, %arg2 : i32, i32, i32
  }
}

</mosaic_0001>

<bundles_post_ra>
// kernel: tpu_custom_call.1
= control target key start
LH: loop header
LB: loop body
LE: loop exit
PB: predicated region body
PF: predicated region fallthrough
CT: control target
= control target key end

     0   :  { %s1334_s0 = inlined_call_operand.hbm [shape: f32[8,8,32], index: 0, kind: input, shape index: {}]   ;;  %s1335_s1 = inlined_call_operand.hbm [shape: f32[8,8,32], index: 1, kind: input, shape index: {}]   ;;  %s1336_s2 = inlined_call_operand.hbm [shape: f32[8,8,32], index: 2, kind: input, shape index: {}]   ;;  %s1337_s3 = inlined_call_operand.hbm [shape: f32[8,8,32], index: 3, kind: output, shape index: {0}]   ;;  %s1338_s4 = inlined_call_operand.hbm [shape: f32[8,8,8], index: 4, kind: output, shape index: {1}]  }
   0x1   :  { %1342 = sst [smem:[#allocation21_spill]] %s1335_s1 }
   0x2   :  { %10 = vsyncpa [#allocation6], 0 }
   0x3   :  { %12 = vsyncpa [#allocation6 + $0x1], 0 }
   0x4   :  { %13 = vsyncpa [#allocation9], 0 }
   0x5   :  { %15 = vsyncpa [#allocation9 + $0x1], 0 }
   0x6   :  { %16 = vsyncpa [#allocation7], 0 }
   0x7   :  { %18 = vsyncpa [#allocation7 + $0x1], 0 }
   0x8   :  { %19 = vsyncpa [#allocation13], 0 }
   0x9   :  { %21 = vsyncpa [#allocation13 + $0x1], 0  ;;  %s1100_s15 = smov 0   ;;  %s1102_s16 = smov 0  }
   0xa   :  { %s1104_s17 = smov 0   ;;  %s1106_s18 = smov 0  }
   0xb   :  { %s1108_s19 = smov 0   ;;  %s1110_s20 = smov 0  }
   0xc LB: > { %1343 = sst [smem:[#allocation18_spill]] %s1060_s19  ;;  %s1131_s21 = sadd.s32 4294967295, %s1064_s20   ;;  %s1064_s20 = sphi %s1110_s20, %s27_s20   ;;  %s1060_s19 = sphi %s1108_s19, %s1356_s19   ;;  %s1056_s18 = sphi %s1106_s18, %s1355_s18   ;;  %s1052_s17 = sphi %s1104_s17, %s1359_s17   ;;  %s1048_s16 = sphi %s1102_s16, %s1358_s16   ;;  %s1044_s15 = sphi %s1100_s15, %s1357_s15  }
   0xd   : > { %s739_s22 = sadd.s32 4294967294, %s1064_s20   ;;  %s46_s23 = sadd.s32 1, %s1060_s19 }
   0xe   : > { %s55_s24 = sadd.s32 1, %s1052_s17  ;;  %p48_p0 = scmp.ge.s32.totalorder %s46_s23, 8 }
   0xf   : > { %p62_p1 = scmp.ne.s32.totalorder %s1052_s17, %s1048_s16  ;;  %p63_p2 = scmp.eq.s32.totalorder %s1064_s20, 0 }
  0x10   : > { %p68_p3 = scmp.ne.s32.totalorder %s1048_s16, %s1044_s15  ;;  %s1361_s23 = smov (%p48_p0, %s46_s23), 0 }
  0x11   : > { %1344 = sst [smem:[#allocation19_spill]] %s1361_s23  ;;  %p1143_p4 = por %p63_p2, %p62_p1 }
  0x12   : > { %p69_p5 = scmp.eq.s32.totalorder %s1131_s21, 0  ;;  %s50_s26 = ssub.s32 %s1060_s19, %s1361_s23 }
  0x13   : > { %p150_p6 = scmp.eq.s32.totalorder %s1131_s21, 7  ;;  %p53_p7 = scmp.eq.s32.totalorder %s50_s26, 0 }
  0x14   : > { %p1151_p8 = por %p69_p5, %p68_p3  ;;  %p156_p10 = scmp.eq.s32.totalorder %s739_s22, 7 }
  0x15   : > { %p1155_p9 = por %p150_p6, %p62_p1  ;;  %p804_p12 = scmp.lt.s32.totalorder %s1064_s20, 8 }
  0x16   : > { %s1160_s29 = scalar_select %p53_p7, %s1052_s17, %s55_s24  }
  0x17   : > { %p1162_p11 = por %p156_p10, %p68_p3  ;;  %s1339_s5 = sand.u32 1, %s1052_s17  }
  0x18   : > { %1348 = sst [smem:[#allocation20_spill]] %s1160_s29  ;;  %s1170_s6 = sshll.u32 %s1339_s5, 3 }
  0x19   : > { %s1173_s7 = sshll.u32 %s1060_s19, 7  ;;  %p1177_p13 = pnand %p804_p12, %p1143_p4 }
  0x1a   : > { %s225_s9 = sand.u32 1, %s1064_s20   ;;  %s1351_s1 = sld [smem:[#allocation21_spill]] }
  0x1b   : > { %s229_s13 = scalar_lea.vmem [#allocation8], %s1170_s6  ;;  %p748_p0 = scmp.ge.s32.totalorder %s1064_s20, 1 }
  0x1c   : > { %s237_s14 = sshll.u32 %s229_s13, 4  ;;  %p261_p1 = scmp.lt.s32.totalorder %s1064_s20, 9  ;;  %s238_s14 = int_to_ptr.vmem [resolvable:$true] %s237_s14 }
  0x1d   : > { %s1189_s22 = scalar_lea.sflag [#allocation9], %s225_s9  ;;  %p868_p2 = pneg %p1177_p13 }
  0x1e   : > { %s879_s24 = scalar_lea.vmem %s238_s14, 128  ;;  %s1066_s25 = smov [#allocation8]  }
  0x1f   : > { %p880_p3 = scmp.ne.s32.totalorder %s238_s14, %s879_s24  ;;  %s884_s26 = sshll.u32 %s1066_s25, 4  ;;  %s885_s26 = int_to_ptr.vmem [resolvable:$false] %s884_s26 }
  0x20   : > { %s235_s12 = scalar_lea.hbm %s1351_s1, %s1173_s7  ;;  %s886_s10 = scalar_lea.vmem %s885_s26, 256 }
  0x21   : > { %p882_p4 = pnand %p880_p3, %p868_p2  ;;  %p887_p6 = scmp.lt.s32.totalorder %s238_s14, %s885_s26 }
  0x22   : > { %p888_p7 = scmp.lt.s32.totalorder %s886_s10, %s879_s24 }
  0x23   : > { %p883_p5 = pneg %p882_p4 }
  0x24   : > { %p889_p10 = por %p888_p7, %p887_p6 }
  0x26   : > { %p890_p12 = pnand %p889_p10, %p883_p5 }
  0x28   : > { %893 = shalt.err (!%p890_p12)
}
  0x29   : > { %793 = dma.hbm_to_vmem [thread:$0]  (!%p1177_p13), %s235_s12, 128, %s238_s14, %s1189_s22  }
  0x2a   : > { %p1203_p3 = pnand %p748_p0, %p261_p1  ;;  %s216_s24 = scalar_lea.hbm %s1334_s0, %s1173_s7 }
  0x2b   : > { %s210_s25 = scalar_lea.vmem [#allocation5], %s1170_s6  ;;  %s254_s1 = scalar_lea.hbm %s1336_s2, %s1173_s7 }
  0x2c   : > { %s218_s26 = sshll.u32 %s210_s25, 4  ;;  %s1353_s23 = sand.u32 1, %s1052_s17   ;;  %s219_s26 = int_to_ptr.vmem [resolvable:$true] %s218_s26 }
  0x2d   : > { %s207_s19 = scalar_lea.sflag [#allocation6], %s1353_s23  ;;  %s907_s12 = scalar_lea.vmem %s219_s26, 128 }
  0x2e   : > { %p908_p4 = scmp.ne.s32.totalorder %s219_s26, %s907_s12  ;;  %s1067_s14 = smov [#allocation5]  }
  0x2f   : > { %s912_s29 = sshll.u32 %s1067_s14, 4  ;;  %s913_s29 = int_to_ptr.vmem [resolvable:$false] %s912_s29 }
  0x30   : > { %p910_p0 = pnand %p908_p4, %p868_p2  ;;  %s914_s11 = scalar_lea.vmem %s913_s29, 256 }
  0x31   : > { %p915_p5 = scmp.lt.s32.totalorder %s219_s26, %s913_s29  ;;  %p916_p6 = scmp.lt.s32.totalorder %s914_s11, %s907_s12 }
  0x32   : > { %p911_p1 = pneg %p910_p0 }
  0x33   : > { %p917_p7 = por %p916_p6, %p915_p5 }
  0x35   : > { %p918_p10 = pnand %p917_p7, %p911_p1 }
  0x37   : > { %921 = shalt.err (!%p918_p10)
}
  0x38   : > { %790 = dma.hbm_to_vmem [thread:$0]  (!%p1177_p13), %s216_s24, 128, %s219_s26, %s207_s19  }
  0x39   : > { %s248_s23 = scalar_lea.vmem [#allocation10], %s1170_s6  ;;  %s1068_s25 = smov [#allocation10]  }
  0x3a   : > { %s256_s5 = sshll.u32 %s248_s23, 4  ;;  %s940_s29 = sshll.u32 %s1068_s25, 4  ;;  %s257_s5 = int_to_ptr.vmem [resolvable:$true] %s256_s5  ;;  %s941_s29 = int_to_ptr.vmem [resolvable:$false] %s940_s29 }
  0x3b   : > { %s935_s13 = scalar_lea.vmem %s257_s5, 128  ;;  %s942_s10 = scalar_lea.vmem %s941_s29, 256 }
  0x3c   : > { %p936_p12 = scmp.ne.s32.totalorder %s257_s5, %s935_s13  ;;  %p943_p1 = scmp.lt.s32.totalorder %s257_s5, %s941_s29 }
  0x3d   : > { %p944_p5 = scmp.lt.s32.totalorder %s942_s10, %s935_s13 }
  0x3e   : > { %p938_p4 = pnand %p936_p12, %p868_p2 }
  0x3f   : > { %p945_p6 = por %p944_p5, %p943_p1 }
  0x40   : > { %p939_p0 = pneg %p938_p4 }
  0x42   : > { %p946_p7 = pnand %p945_p6, %p939_p0 }
  0x44   : > { %949 = shalt.err (!%p946_p7)
}
  0x45   : > { %796 = dma.hbm_to_vmem [thread:$0]  (!%p1177_p13), %s254_s1, 128, %s257_s5, %s1189_s22  }
  0x46   : > { %265 = sbr.rel (%p1203_p3) target bundleno = 865 (0x361), region = 32  ;;  %s1238_s24 = sand.u32 (!%p1203_p3), 1, %s1048_s16  }
  0x47   : > { %s1241_s26 = sshll.u32 (!%p1203_p3), %s1238_s24, 3  ;;  %s268_s8 = scalar_lea.sflag (!%p1203_p3), [#allocation6], %s1238_s24 }
  0x48   : > { %s271_s12 = scalar_lea.vmem (!%p1203_p3), [#allocation5], %s1241_s26 }
  0x4b   : > { %1027 = dma.done.wait (%p1151_p8), %s268_s8, 128  }
  0x4c   : > { %1029 = vsyncadd (%p1151_p8), %s268_s8, 4294967168  ;;  %s276_s1 = sand.u32 1, %s1131_s21   ;;  %s280_s22 = scalar_lea.vmem [#allocation8], %s1241_s26 }
  0x4d   : > { %s277_s7 = scalar_lea.sflag [#allocation9], %s276_s1 }
  0x4e   : > { %1031 = dma.done.wait (%p1151_p8), %s277_s7, 256  }
  0x4f   : > { %1033 = vsyncadd (%p1151_p8), %s277_s7, 4294967040  ;;  %vm336_vm0 = vcmask 261120   ;;  %v1069_v0 = vmov 0.0   ;;  %vm1070_vm1 = vmmov 0   ;;  %v339_v1 = vld [vmem:[%s280_s22] sm:$0xff]  ;;  %v338_v2 = vld [vmem:[%s271_s12] sm:$0xff] }
  0x50   : > { %767 = vmatprep.subr.mxu0 %v1069_v0  ;;  %337 = vst.msk [vmem:[#allocation4] sm:$0xff] %vm336_vm0, %v1069_v0  ;;  %769 = vmatprep.mubr.msk.f32.mxu0 %vm1070_vm1, %v1069_v0  ;;  %vm333_vm2 = vcmask 7168   ;;  %v1071_v3 = vmov -inf   ;;  %vm418_vm3 = vcmask 64512   ;;  %s328_s21 = scalar_lea.vmem [#allocation12], %s1241_s26  ;;  %v1072_v8 = vmov 0  }
  0x51   : > { %772 = vmatprep.subr.mxu1 %v1069_v0  ;;  %774 = vmatprep.mubr.msk.f32.mxu1 %vm1070_vm1, %v1069_v0  ;;  %334 = vst.msk [vmem:[#allocation2] sm:$0xff] %vm333_vm2, %v1071_v3  ;;  %335 = vst.msk [vmem:[#allocation3] sm:$0xff] %vm333_vm2, %v1069_v0  ;;  %s289_s27 = scalar_lea.vmem [#allocation10], %s1241_s26  ;;  %s759_s9 = sshll.u32 %s1056_s18, 7 }
  0x52   : > { %768 = vmatpush3.xpose.msk.msra.mxu0 %vm336_vm0, %v339_v1  ;;  %858 = vset.pattern.permute.xlu0 %v1072_v8  ;;  %v451_v13 = vld [vmem:[%s289_s27] sm:$0xff]  ;;  %s574_s23 = scalar_lea.hbm %s1338_s4, %s759_s9  ;;  %s576_s5 = sshll.u32 %s328_s21, 4  ;;  %s577_s5 = int_to_ptr.vmem [resolvable:$true] %s576_s5 }
  0x53   : > { %859 = vset.pattern.permute.xlu1 %v1072_v8  ;;  %773 = vmatpush3.msra.mxu1 %v451_v13  ;;  %s547_s13 = scalar_lea.sflag [#allocation13], %s1238_s24  ;;  %s950_s25 = scalar_lea.vmem %s577_s5, 128 }
  0x54   : > { %p951_p8 = scmp.ne.s32.totalorder %s577_s5, %s950_s25  ;;  %s1073_s29 = smov [#allocation12]  }
  0x55   : > { %770 = vmatmul.mubr.msk.f32.vlgmr.msra.gmra.mxu0 %vm336_vm0, %v338_v2  ;;  %s954_s10 = sshll.u32 %s1073_s29, 4  ;;  %s955_s10 = int_to_ptr.vmem [resolvable:$false] %s954_s10 }
  0x56   : > { %p952_p13 = pnand %p951_p8, %p1155_p9  ;;  %s956_s19 = scalar_lea.vmem %s955_s10, 256 }
  0x57   : > { %p957_p3 = scmp.lt.s32.totalorder %s577_s5, %s955_s10  ;;  %p958_p10 = scmp.lt.s32.totalorder %s956_s19, %s950_s25 }
  0x58   : > { %v420_v9 = vld [vmem:[#allocation2] sm:$0xff]  ;;  %v436_v21 = vld [vmem:[#allocation3] sm:$0xff]  ;;  %p953_p2 = pneg %p952_p13 }
  0x59   : > { %p959_p12 = por %p958_p10, %p957_p3 }
  0x5b   : > { %p960_p4 = pnand %p959_p12, %p953_p2 }
 0x115   : > { %v413_v4 = vpop.f32.mrf.mxu0 }
 0x116   : > { %v417_v5 = vmul.f32 0.17677669, %v413_v4 }
 0x117   : > { %v771_v6 = vpop.f32.mrf.mxu0 }
 0x118   : > { %v421_v7 = vsel %vm418_vm3, %v417_v5, -inf  ;;  %419 = vst.msk [vmem:[%s328_s21] sm:$0xff] %vm418_vm3, %v417_v5 }
 0x119   : > { %422 = vmax.xlane.f32.xlu0 %v421_v7 }
 0x1a2   : > { %v423_v10 = vpop.xlane.xlu0 %422 }
 0x1a3   : > { %v424_v11 = vmax.f32 %v420_v9, %v423_v10 }
 0x1a5   : > { %v425_v12 = vsub.f32 %v420_v9, %v424_v11  ;;  %527 = vst.msk [vmem:[#allocation2] sm:$0xff] %vm333_vm2, %v424_v11  ;;  %430 = vperm.xlu0 %858, %v424_v11  }
 0x1a7   : > { %v426_v18 = vmul.f32 1.442695, %v425_v12 }
 0x220   : > { %v431_v14 = vpop.permute.xlu0 %430 }
 0x221   : > { %v433_v15 = vsub.f32 %v417_v5, %v431_v14 }
 0x223   : > { %v434_v16 = vmul.f32 1.442695, %v433_v15 }
 0x225   : > { %860 = vpow2.f32 %v434_v16 }
 0x226   : > { %862 = vpow2.f32 %v426_v18 }
 0x232   : > { %v861_v17 = vpop.eup %860 }
 0x233   : > { %775 = vmatmul.mubr.msk.f32.vlgmr.msra.gmra.mxu1 %vm418_vm3, %v861_v17  ;;  %v438_v19 = vsel %vm418_vm3, %v861_v17, 0.0  ;;  %v863_v20 = vpop.eup %862 }
 0x234   : > { %439 = vadd.xlane.f32.xlu1 %v438_v19  ;;  %v437_v22 = vmul.f32 %v863_v20, %v436_v21 }
 0x245   : > { %447 = vperm.xlu1 %859, %v863_v20  }
 0x2bd   : > { %v440_v23 = vpop.xlane.xlu1 %439 }
 0x2be   : > { %v441_v24 = vadd.f32 %v440_v23, %v437_v22 }
 0x2c0   : > { %443 = vst.msk [vmem:[#allocation3] sm:$0xff] %vm333_vm2, %v441_v24 }
 0x2c7   : > { %v531_v25 = vld [vmem:[#allocation3] sm:$0xff] }
 0x2c8   : > { %864 = vrcp.f32 %v531_v25 }
 0x2d5   : > { %v865_v26 = vpop.eup %864 }
 0x2d6   : > { %536 = vperm.xlu1 %859, %v865_v26  }
 0x2d7   : > { %963 = shalt.err (!%p960_p4)
}
 0x2d8   : > { %s964_s6 = scalar_lea.hbm %s574_s23, 128  ;;  %s968_s1 = scalar_lea.hbm %s1338_s4, 1024 }
 0x2d9   : > { %p965_p0 = scmp.ne.s32.totalorder %s574_s23, %s964_s6  ;;  %p969_p6 = scmp.lt.s32.totalorder %s574_s23, %s1338_s4 }
 0x2da   : > { %p970_p7 = scmp.lt.s32.totalorder %s968_s1, %s964_s6 }
 0x2db   : > { %p966_p1 = pnand %p965_p0, %p1155_p9 }
 0x2dc   : > { %p971_p8 = por %p970_p7, %p969_p6 }
 0x2dd   : > { %p967_p5 = pneg %p966_p1 }
 0x2df   : > { %p972_p13 = pnand %p971_p8, %p967_p5 }
 0x2e1   : > { %975 = shalt.err (!%p972_p13)
}
 0x2e2   : > { %784 = dma.vmem_to_hbm [thread:$0]  (%p1155_p9), %s577_s5, 128, %s574_s23, %s547_s13   ;;  %v444_v27 = vld [vmem:[#allocation4] sm:$0xff]  ;;  %v448_v28 = vpop.permute.xlu1 %447 }
 0x2e3   : > { %v450_v29 = vmul.f32 %v448_v28, %v444_v27  ;;  %s321_s21 = scalar_lea.vmem [#allocation11], %s1241_s26  ;;  %s559_s23 = scalar_lea.hbm %s1337_s3, %s759_s9 }
 0x2e4   : > { %s561_s27 = sshll.u32 %s321_s21, 4  ;;  %s542_s5 = scalar_lea.sflag [#allocation7], %s1238_s24  ;;  %s562_s27 = int_to_ptr.vmem [resolvable:$true] %s561_s27 }
 0x2e5   : > { %s976_s13 = scalar_lea.vmem %s562_s27, 128  ;;  %s1074_s25 = smov [#allocation11]  }
 0x2e6   : > { %p977_p2 = scmp.ne.s32.totalorder %s562_s27, %s976_s13  ;;  %s980_s26 = sshll.u32 %s1074_s25, 4  ;;  %s981_s26 = int_to_ptr.vmem [resolvable:$false] %s980_s26 }
 0x2e7   : > { %s982_s29 = scalar_lea.vmem %s981_s26, 256  ;;  %p983_p12 = scmp.lt.s32.totalorder %s562_s27, %s981_s26 }
 0x2e8   : > { %p978_p3 = pnand %p977_p2, %p1155_p9  ;;  %p984_p4 = scmp.lt.s32.totalorder %s982_s29, %s976_s13 }
 0x2ea   : > { %p979_p10 = pneg %p978_p3  ;;  %p985_p0 = por %p984_p4, %p983_p12 }
 0x2ec   : > { %p986_p1 = pnand %p985_p0, %p979_p10 }
 0x2f3   : > { %v521_v30 = vpop.f32.mrf.mxu1 }
 0x2f4   : > { %v525_v31 = vadd.f32 %v521_v30, %v450_v29 }
 0x2f5   : > { %v776_v32 = vpop.f32.mrf.mxu1 }
 0x2f6   : > { %526 = vst.msk [vmem:[#allocation4] sm:$0xff] %vm336_vm0, %v525_v31 }
 0x2fd   : > { %v533_v33 = vld [vmem:[#allocation4] sm:$0xff] }
 0x351   : > { %v537_v34 = vpop.permute.xlu1 %536 }
 0x352   : > { %v539_v35 = vmul.f32 %v537_v34, %v533_v33 }
 0x354   : > { %540 = vst.msk [vmem:[%s321_s21] sm:$0xff] %vm336_vm0, %v539_v35 }
 0x355   : > { %989 = shalt.err (!%p986_p1)
}
 0x356   : > { %s990_s18 = scalar_lea.hbm %s559_s23, 128  ;;  %s994_s10 = scalar_lea.hbm %s1337_s3, 1024 }
 0x357   : > { %p991_p5 = scmp.ne.s32.totalorder %s559_s23, %s990_s18  ;;  %p995_p8 = scmp.lt.s32.totalorder %s559_s23, %s1337_s3 }
 0x358   : > { %p996_p13 = scmp.lt.s32.totalorder %s994_s10, %s990_s18 }
 0x359   : > { %p992_p6 = pnand %p991_p5, %p1155_p9 }
 0x35a   : > { %p997_p2 = por %p996_p13, %p995_p8 }
 0x35b   : > { %p993_p7 = pneg %p992_p6 }
 0x35d   : > { %p998_p3 = pnand %p997_p2, %p993_p7 }
 0x35f   : > { %1001 = shalt.err (!%p998_p3)
}
 0x360   : > { %783 = dma.vmem_to_hbm [thread:$0]  (%p1155_p9), %s562_s27, 128, %s559_s23, %s542_s5  }
 0x361 PF: > { %p805_p10 = scmp.ge.s32.totalorder %s1064_s20, 2  ;;  %s588_s8 = sand.u32 1, %s1044_s15  }
 0x362   : > { %s589_s12 = scalar_lea.sflag [#allocation7], %s588_s8 }
 0x363   : > { %p798_p12 = pnand %p805_p10, %p1162_p11 }
 0x365   : > { %p799_p4 = pneg %p798_p12 }
 0x367   : > { %1035 = dma.done.wait (%p799_p4), %s589_s12, 128  }
 0x368   : > { %1037 = vsyncadd (%p799_p4), %s589_s12, 4294967168  ;;  %s598_s1 = scalar_lea.sflag [#allocation13], %s588_s8 }
 0x369   : > { %1039 = dma.done.wait (%p799_p4), %s598_s1, 128  }
 0x36a   : > { %1041 = vsyncadd (%p799_p4), %s598_s1, 4294967168  ;;  %s27_s20 = sadd.s32 1, %s1064_s20   ;;  %s1354_s28 = sld [smem:[#allocation20_spill]] }
 0x36b   : > { %p24_p0 = scmp.ge.s32.totalorder %s27_s20, 10   ;;  %s1355_s18 = sld [smem:[#allocation18_spill]] }
 0x36c   : > { %s1356_s19 = sld [smem:[#allocation19_spill]]  ;;  %s1357_s15 = smov %s1048_s16 }
 0x36d   : > { %s1358_s16 = smov %s1052_s17  ;;  %26 = sbr.rel (!%p24_p0) target bundleno = 12 (0xc), region = 126 }
 0x370   : > { %s1359_s17 = smov %s1354_s28 }
 0x372   :  { %603 = vsyncpa [#allocation6], 1 }
 0x373   :  { %605 = vsyncpa [#allocation6 + $0x1], 1 }
 0x374   :  { %606 = vsyncpa [#allocation9], 1 }
 0x375   :  { %608 = vsyncpa [#allocation9 + $0x1], 1 }
 0x376   :  { %609 = vsyncpa [#allocation7], 1 }
 0x377   :  { %611 = vsyncpa [#allocation7 + $0x1], 1 }
 0x378   :  { %612 = vsyncpa [#allocation13], 1 }
 0x379   :  { %614 = vsyncpa [#allocation13 + $0x1], 1 }

</bundles_post_ra>
